<compile_context>
chip_gen: v6e
topology: v6e:2x2x1
jax: 0.10.0
libtpu: 0.0.40
codegen_flags: <defaults>
</compile_context>

<pallas_src>
import functools

import jax
import jax.numpy as jnp
from jax import lax
from jax.experimental import pallas as pl
from jax.experimental.pallas import tpu as pltpu


def _embedding_head_kernel(x_ref, w1t_ref, b1_ref, w2t_ref, b2_ref, o_ref):
    # x_ref:   (Cin,  TM)  input pixel tile (channels on sublanes, pixels on lanes)
    # w1t_ref: (Cin,  Cin) bf16, first 1x1 conv weight with BN folded in (rows = out ch)
    # b1_ref:  (Cin,  1)   f32, BN-folded bias
    # w2t_ref: (Cemb, Cin) bf16, second 1x1 conv weight (rows = out ch)
    # b2_ref:  (Cemb, 1)   f32
    # o_ref:   (Cemb, TM)
    x = x_ref[...].astype(jnp.bfloat16)          # cast in-kernel: one f32 HBM read

    # Conv2d(Cin, Cin, 1) + folded BatchNorm (eval) + ReLU
    h = jnp.dot(w1t_ref[...], x, preferred_element_type=jnp.float32) + b1_ref[...]
    h = jnp.maximum(h, 0.0)

    # Conv2d(Cin, Cemb, 1)
    y = jnp.dot(w2t_ref[...], h.astype(jnp.bfloat16),
                preferred_element_type=jnp.float32) + b2_ref[...]

    # F.normalize(p=2, dim=channel): y / max(||y||_2, 1e-12)
    #   == y * rsqrt(max(sum(y*y), 1e-24));  rsqrt goes to the EUP slot,
    #   the channel (sublane) reduction goes to the XLU slot.
    sumsq = jnp.sum(y * y, axis=0, keepdims=True)           # (1, TM)
    inv = lax.rsqrt(jnp.maximum(sumsq, 1e-24))
    o_ref[...] = (y * inv).astype(o_ref.dtype)


def _pick_tile(hw, cin, cemb, tile_m):
    """Pixel-tile size: multiple of 128, <= tile_m, VMEM-aware.

    Caps the tile so the double-buffered pipeline buffers (f32 input tile +
    f32 output tile, x2 buffers each) stay around <= 8 MiB -> safe on every
    generation's scoped-VMEM default while leaving room for in-body temps.
    """
    per_px_bytes = (cin + cemb) * 4 * 2
    budget = 8 << 20
    cap = max(128, (budget // per_px_bytes) // 128 * 128)
    tm = min(tile_m, cap, ((hw + 127) // 128) * 128)
    return max(128, (tm // 128) * 128)


@functools.partial(jax.jit, static_argnames=("tile_m",))
def embedding_head(x_nchw, w1, b1, gamma, beta, running_mean, running_var,
                   w2, b2, tile_m=2048):
    """x_nchw: (N, Cin, H, W) float32 -> (N, Cemb, H, W) float32.

    w1: (Cin, Cin) and w2: (Cin, Cemb) are the 1x1 conv weights in matmul
    form (in_ch, out_ch); b1/b2 are the conv biases; gamma/beta/running_*
    are the BatchNorm2d (eval-mode) parameters.
    """
    N, Cin, H, W = x_nchw.shape
    Cemb = w2.shape[1]
    eps = 1e-5  # BatchNorm2d default

    # Fold BN (eval mode) into the first conv:  scale*(x@w1 + b1) + shift
    scale = gamma / jnp.sqrt(running_var + eps)
    shift = beta - running_mean * scale
    # Channel-rows orientation (out_ch, in_ch) for  w @ x  with pixels on lanes.
    w1t = (w1 * scale[None, :]).T.astype(jnp.bfloat16)        # (Cin, Cin)
    b1f = (b1 * scale + shift).reshape(Cin, 1).astype(jnp.float32)
    w2t = w2.T.astype(jnp.bfloat16)                           # (Cemb, Cin)
    b2c = b2.reshape(Cemb, 1).astype(jnp.float32)

    # (N, Cin, H, W) -> (N, Cin, H*W): pure reshape, no transpose / extra HBM pass.
    HW = H * W
    x_cp = x_nchw.reshape(N, Cin, HW)

    tm = _pick_tile(HW, Cin, Cemb, tile_m)
    HW_pad = ((HW + tm - 1) // tm) * tm
    if HW_pad != HW:
        # Zero-pad ragged pixel counts (padded columns are sliced off below);
        # skipped entirely when H*W is already a multiple of the tile size.
        x_cp = jnp.pad(x_cp, ((0, 0), (0, 0), (0, HW_pad - HW)))

    grid = (N, HW_pad // tm)
    full = lambda n, j: (0, 0)

    out = pl.pallas_call(
        _embedding_head_kernel,
        out_shape=jax.ShapeDtypeStruct((N, Cemb, HW_pad), jnp.float32),
        grid_spec=pltpu.PrefetchScalarGridSpec(
            num_scalar_prefetch=0,
            grid=grid,
            in_specs=[
                pl.BlockSpec((pl.Squeezed(), Cin, tm), lambda n, j: (n, 0, j)),  # x
                pl.BlockSpec((Cin, Cin), full),    # w1t (BN folded)
                pl.BlockSpec((Cin, 1), full),      # b1f
                pl.BlockSpec((Cemb, Cin), full),   # w2t
                pl.BlockSpec((Cemb, 1), full),     # b2
            ],
            out_specs=pl.BlockSpec((pl.Squeezed(), Cemb, tm),
                                   lambda n, j: (n, 0, j)),
        ),
        compiler_params=pltpu.CompilerParams(
            dimension_semantics=("parallel", "parallel")),
    )(x_cp, w1t, b1f, w2t, b2c)

    # (N, Cemb, HW_pad) -> (N, Cemb, H, W): slice off padding, pure reshape.
    return out[:, :, :HW].reshape(N, Cemb, H, W)


def _reference(x_nchw, w1, b1, gamma, beta, rm, rv, w2, b2):
    """Pure-JAX f32 reference matching PyTorch eval-mode semantics."""
    eps = 1e-5
    N, Cin, H, W = x_nchw.shape
    x = jnp.transpose(x_nchw, (0, 2, 3, 1)).reshape(-1, Cin)
    h = x @ w1 + b1
    h = (h - rm) / jnp.sqrt(rv + eps) * gamma + beta
    h = jnp.maximum(h, 0.0)
    y = h @ w2 + b2
    y = y / jnp.maximum(jnp.sqrt(jnp.sum(y * y, axis=-1, keepdims=True)), 1e-12)
    return jnp.transpose(y.reshape(N, H, W, -1), (0, 3, 1, 2))


if __name__ == "__main__":
    key = jax.random.PRNGKey(0)
    k = jax.random.split(key, 8)

    N, Cin, H, W = 2, 32, 16, 16
    Cemb = 64

    x = jax.random.normal(k[0], (N, Cin, H, W), dtype=jnp.float32)

    # Deterministic synthetic parameters (matmul-form weights of the 1x1 convs)
    w1 = jax.random.normal(k[1], (Cin, Cin), dtype=jnp.float32) * 0.1
    b1 = jax.random.normal(k[2], (Cin,), dtype=jnp.float32) * 0.1
    gamma = 1.0 + 0.1 * jax.random.normal(k[3], (Cin,), dtype=jnp.float32)
    beta = 0.1 * jax.random.normal(k[4], (Cin,), dtype=jnp.float32)
    running_mean = 0.1 * jax.random.normal(k[5], (Cin,), dtype=jnp.float32)
    running_var = jnp.abs(1.0 + 0.1 * jax.random.normal(k[6], (Cin,),
                                                        dtype=jnp.float32))
    w2 = jax.random.normal(k[7], (Cin, Cemb), dtype=jnp.float32) * 0.1
    b2 = jnp.zeros((Cemb,), dtype=jnp.float32)

    out = embedding_head(x, w1, b1, gamma, beta, running_mean, running_var,
                         w2, b2)
    out = jax.block_until_ready(out)

    ref = _reference(x, w1, b1, gamma, beta, running_mean, running_var, w2, b2)
    assert out.shape == (N, Cemb, H, W)
    # bf16 matmul operands (f32 accumulate) on L2-normalized outputs:
    # tolerance loosened accordingly vs. the f32 reference.
    assert jnp.allclose(out, ref, atol=2e-2, rtol=1e-2)

    print("KERNEL_OK")
</pallas_src>

<mosaic_0001>
module attributes {stable_mosaic.version = 11 : i64} {
  func.func @_embedding_head_kernel(%arg0: i32, %arg1: i32, %arg2: memref<1x32x256xf32, #tpu.memory_space<vmem>>, %arg3: memref<32x32xbf16, #tpu.memory_space<vmem>>, %arg4: memref<32x1xf32, #tpu.memory_space<vmem>>, %arg5: memref<64x32xbf16, #tpu.memory_space<vmem>>, %arg6: memref<64x1xf32, #tpu.memory_space<vmem>>, %arg7: memref<1x64x256xf32, #tpu.memory_space<vmem>>) attributes {dimension_semantics = [#tpu.dimension_semantics<parallel>, #tpu.dimension_semantics<parallel>], iteration_bounds = array<i64: 2, 1>, scalar_prefetch = 0 : i64, scratch_operands = 0 : i64, tpu.core_type = #tpu.core_type<tc>, window_params = [{transform_indices = @transform_0, window_bounds = array<i64: 1, 32, 256>}, {pipeline_mode = #tpu.pipeline_mode<synchronous>, transform_indices = @transform_1, window_bounds = array<i64: 32, 32>}, {pipeline_mode = #tpu.pipeline_mode<synchronous>, transform_indices = @transform_2, window_bounds = array<i64: 32, 1>}, {pipeline_mode = #tpu.pipeline_mode<synchronous>, transform_indices = @transform_3, window_bounds = array<i64: 64, 32>}, {pipeline_mode = #tpu.pipeline_mode<synchronous>, transform_indices = @transform_4, window_bounds = array<i64: 64, 1>}, {transform_indices = @transform_5, window_bounds = array<i64: 1, 64, 256>}]} {
    %c0 = arith.constant 0 : index
    %c0_0 = arith.constant 0 : index
    %c0_1 = arith.constant 0 : index
    %0 = vector.load %arg2[%c0, %c0_0, %c0_1] : memref<1x32x256xf32, #tpu.memory_space<vmem>>, vector<1x32x256xf32>
    %1 = vector.shape_cast %0 : vector<1x32x256xf32> to vector<32x256xf32>
    %2 = arith.truncf %1 : vector<32x256xf32> to vector<32x256xbf16>
    %c0_2 = arith.constant 0 : index
    %c0_3 = arith.constant 0 : index
    %3 = vector.load %arg3[%c0_2, %c0_3] : memref<32x32xbf16, #tpu.memory_space<vmem>>, vector<32x32xbf16>
    %cst = arith.constant dense<0.000000e+00> : vector<32x256xf32>
    %4 = tpu.matmul %3, %2, %cst {dimension_numbers = #tpu.dot_dimension_numbers<[1], [0], [0], [1], [0, 0, 1, 1], [], []>} : vector<32x32xbf16>, vector<32x256xbf16>, vector<32x256xf32> -> vector<32x256xf32>
    %c0_4 = arith.constant 0 : index
    %c0_5 = arith.constant 0 : index
    %5 = vector.load %arg4[%c0_4, %c0_5] : memref<32x1xf32, #tpu.memory_space<vmem>>, vector<32x1xf32>
    %6 = vector.broadcast %5 : vector<32x1xf32> to vector<32x256xf32>
    %7 = arith.addf %4, %6 : vector<32x256xf32>
    %cst_6 = arith.constant 0.000000e+00 : f32
    %8 = vector.broadcast %cst_6 : f32 to vector<32x256xf32>
    %9 = arith.maximumf %7, %8 : vector<32x256xf32>
    %c0_7 = arith.constant 0 : index
    %c0_8 = arith.constant 0 : index
    %10 = vector.load %arg5[%c0_7, %c0_8] : memref<64x32xbf16, #tpu.memory_space<vmem>>, vector<64x32xbf16>
    %11 = arith.truncf %9 : vector<32x256xf32> to vector<32x256xbf16>
    %cst_9 = arith.constant dense<0.000000e+00> : vector<64x256xf32>
    %12 = tpu.matmul %10, %11, %cst_9 {dimension_numbers = #tpu.dot_dimension_numbers<[1], [0], [0], [1], [0, 0, 1, 1], [], []>} : vector<64x32xbf16>, vector<32x256xbf16>, vector<64x256xf32> -> vector<64x256xf32>
    %c0_10 = arith.constant 0 : index
    %c0_11 = arith.constant 0 : index
    %13 = vector.load %arg6[%c0_10, %c0_11] : memref<64x1xf32, #tpu.memory_space<vmem>>, vector<64x1xf32>
    %14 = vector.broadcast %13 : vector<64x1xf32> to vector<64x256xf32>
    %15 = arith.addf %12, %14 : vector<64x256xf32>
    %16 = arith.mulf %15, %15 : vector<64x256xf32>
    %cst_12 = arith.constant dense<0.000000e+00> : vector<256xf32>
    %17 = vector.multi_reduction <add>, %16, %cst_12 [0] : vector<64x256xf32> to vector<256xf32>
    %18 = vector.shape_cast %17 : vector<256xf32> to vector<1x256xf32>
    %cst_13 = arith.constant 1.000000e-24 : f32
    %19 = vector.broadcast %cst_13 : f32 to vector<1x256xf32>
    %20 = arith.maximumf %18, %19 : vector<1x256xf32>
    %21 = math.rsqrt %20 : vector<1x256xf32>
    %22 = vector.broadcast %21 : vector<1x256xf32> to vector<64x256xf32>
    %23 = arith.mulf %15, %22 : vector<64x256xf32>
    %c0_14 = arith.constant 0 : index
    %c0_15 = arith.constant 0 : index
    %c0_16 = arith.constant 0 : index
    %24 = vector.load %arg7[%c0_14, %c0_15, %c0_16] : memref<1x64x256xf32, #tpu.memory_space<vmem>>, vector<1x64x256xf32>
    %25 = vector.shape_cast %24 : vector<1x64x256xf32> to vector<64x256xf32>
    %26 = vector.shape_cast %23 : vector<64x256xf32> to vector<1x64x256xf32>
    tpu.vector_store %arg7[%c0_14, %c0_15, %c0_16], %26 {strides = array<i32>} : memref<1x64x256xf32, #tpu.memory_space<vmem>>, vector<1x64x256xf32>,
    return
  }
  func.func @transform_0(%arg0: i32, %arg1: i32) -> (i32, i32, i32) {
    %c0_i32 = arith.constant 0 : i32
    %c0_i32_0 = arith.constant 0 : i32
    return %arg0, %c0_i32, %arg1 : i32, i32, i32
  }
  func.func @transform_1(%arg0: i32, %arg1: i32) -> (i32, i32) {
    %c0_i32 = arith.constant 0 : i32
    %c0_i32_0 = arith.constant 0 : i32
    %c0_i32_1 = arith.constant 0 : i32
    return %c0_i32, %c0_i32_0 : i32, i32
  }
  func.func @transform_2(%arg0: i32, %arg1: i32) -> (i32, i32) {
    %c0_i32 = arith.constant 0 : i32
    %c0_i32_0 = arith.constant 0 : i32
    %c0_i32_1 = arith.constant 0 : i32
    return %c0_i32, %c0_i32_0 : i32, i32
  }
  func.func @transform_3(%arg0: i32, %arg1: i32) -> (i32, i32) {
    %c0_i32 = arith.constant 0 : i32
    %c0_i32_0 = arith.constant 0 : i32
    %c0_i32_1 = arith.constant 0 : i32
    return %c0_i32, %c0_i32_0 : i32, i32
  }
  func.func @transform_4(%arg0: i32, %arg1: i32) -> (i32, i32) {
    %c0_i32 = arith.constant 0 : i32
    %c0_i32_0 = arith.constant 0 : i32
    %c0_i32_1 = arith.constant 0 : i32
    return %c0_i32, %c0_i32_0 : i32, i32
  }
  func.func @transform_5(%arg0: i32, %arg1: i32) -> (i32, i32, i32) {
    %c0_i32 = arith.constant 0 : i32
    %c0_i32_0 = arith.constant 0 : i32
    return %arg0, %c0_i32, %arg1 : i32, i32, i32
  }
}

</mosaic_0001>

<bundles_post_ra>
// kernel: embedding_head.1
= control target key start
LH: loop header
LB: loop body
LE: loop exit
PB: predicated region body
PF: predicated region fallthrough
CT: control target
= control target key end

     0   :  { %s834_s18 = smov 0   ;;  %s836_s19 = smov 0   ;;  %s1007_s0 = inlined_call_operand.vmem [shape: f32[2,32,256], index: 0, kind: input, shape index: {}]   ;;  %s1008_s1 = inlined_call_operand.vmem [shape: bf16[32,32], index: 1, kind: input, shape index: {}]   ;;  %s1009_s2 = inlined_call_operand.vmem [shape: f32[32,1], index: 2, kind: input, shape index: {}]   ;;  %s1010_s3 = inlined_call_operand.vmem [shape: bf16[64,32], index: 3, kind: input, shape index: {}]   ;;  %s1011_s4 = inlined_call_operand.vmem [shape: f32[64,1], index: 4, kind: input, shape index: {}]   ;;  %s1012_s5 = inlined_call_operand.vmem [shape: f32[2,64,256], index: 5, kind: output, shape index: {}]  }
   0x1   :  { %s838_s20 = smov 0  }
   0x2 LB: > { %s27_s21 = sadd.s32 1, %s797_s19  ;;  %p717_p0 = scmp.ge.s32.totalorder %s801_s20, 1  ;;  %s801_s20 = sphi %s838_s20, %s15_s20   ;;  %s797_s19 = sphi %s836_s19, %s1014_s19   ;;  %s793_s18 = sphi %s834_s18, %s1013_s18  }
   0x3   : > { %p29_p1 = scmp.ge.s32.totalorder %s27_s21, 2  ;;  %p208_p2 = scmp.lt.s32.totalorder %s801_s20, 3 }
   0x5   : > { %s1016_s21 = smov (%p29_p1, %s27_s21), 0  ;;  %p209_p3 = pnand %p717_p0, %p208_p2 }
   0x6   : > { %p245_p4 = scmp.lt.s32.totalorder (!%p209_p3), %s793_s18, 1 }
   0x7   : > { %212 = sbr.rel (%p209_p3) target bundleno = 506 (0x1fa), region = 40 }
   0xc   : > { %v803_v0 = vmov 0   ;;  %s1018_s18 = smov (!%p245_p4, %s793_s18), 1  ;;  %v283_v1 = vld [vmem:[%s1009_s2 + $0x10] sm:$0xff]  ;;  %v281_v2 = vld [vmem:[%s1009_s2] sm:$0xff]  ;;  %v284_v3 = vld [vmem:[%s1009_s2 + $0x18] sm:$0xff]  ;;  %vm315_vm0 = vcmask 261120  }
   0xd   : > { %354 = vmatprep.mubr.bf16.mxu0 %v803_v0  ;;  %767 = vset.pattern.permute.xlu0 %v803_v0  ;;  %s736_s26 = sshll.u32 %s1018_s18, 6  ;;  %v282_v4 = vld [vmem:[%s1009_s2 + $0x8] sm:$0xff]  ;;  %v395_v8 = vld [vmem:[%s1011_s4] sm:$0xff]  ;;  %v397_v19 = vld [vmem:[%s1011_s4 + $0x10] sm:$0xff]  ;;  %s737_s16 = sshll.u32 %s1018_s18, 7 }
   0xe   : > { %768 = vset.pattern.permute.xlu1 %v803_v0  ;;  %517 = vmatprep.mubr.bf16.mxu1 %v803_v0  ;;  %s252_s6 = scalar_lea.vmem %s1007_s0, %s736_s26  ;;  %v396_v17 = vld [vmem:[%s1011_s4 + $0x8] sm:$0xff]  ;;  %v769_v20 = vld [vmem:[%s1008_s1] sm:$0xff]   ;;  %v398_v21 = vld [vmem:[%s1011_s4 + $0x18] sm:$0xff]  ;;  %s970_s23 = scalar_lea.vmem %s1012_s5, %s737_s16 }
   0xf   : > { %297 = vperm.xlu0 %767, %v283_v1   ;;  %287 = vperm.xlu1 %768, %v281_v2   ;;  %v270_v5 = vld [vmem:[%s252_s6 + $0x28] sm:$0xff]  ;;  %v272_v6 = vld [vmem:[%s252_s6 + $0x38] sm:$0xff]  ;;  %v269_v7 = vld [vmem:[%s252_s6 + $0x20] sm:$0xff] }
  0x10   : > { %v276_v9 = vpack.c.bf16 %v272_v6, %v270_v5  ;;  %v271_v10 = vld [vmem:[%s252_s6 + $0x30] sm:$0xff]  ;;  %v266_v11 = vld [vmem:[%s252_s6 + $0x8] sm:$0xff]  ;;  %v268_v12 = vld [vmem:[%s252_s6 + $0x18] sm:$0xff] }
  0x11   : > { %v275_v13 = vpack.c.bf16 %v271_v10, %v269_v7  ;;  %v274_v14 = vpack.c.bf16 %v268_v12, %v266_v11  ;;  %v265_v15 = vld [vmem:[%s252_s6] sm:$0xff]  ;;  %v267_v16 = vld [vmem:[%s252_s6 + $0x10] sm:$0xff]  ;;  %v400_v23 = vld [vmem:[%s1011_s4 + $0x28] sm:$0xff] }
  0x12   : > { %334 = vmatprep.subr.bf16.mxu0 %v276_v9  ;;  %v273_v18 = vpack.c.bf16 %v267_v16, %v265_v15  ;;  %v399_v22 = vld [vmem:[%s1011_s4 + $0x20] sm:$0xff]  ;;  %v401_v24 = vld [vmem:[%s1011_s4 + $0x30] sm:$0xff]  ;;  %v770_v25 = vld [vmem:[%s1008_s1 + $0x8] sm:$0xff]  }
  0x13   : > { %302 = vperm.xlu0 %767, %v284_v3   ;;  %292 = vperm.xlu1 %768, %v282_v4   ;;  %v402_v26 = vld [vmem:[%s1011_s4 + $0x38] sm:$0xff]  ;;  %v771_v59 = vld [vmem:[%s1010_s3] sm:$0xff]   ;;  %v772_v60 = vld [vmem:[%s1010_s3 + $0x8] sm:$0xff]  }
  0x14   : > { %335 = vmatpush1.bf16.msra.mxu0 %v275_v13  ;;  %v773_v61 = vld [vmem:[%s1010_s3 + $0x10] sm:$0xff]   ;;  %v774_v62 = vld [vmem:[%s1010_s3 + $0x18] sm:$0xff]  }
  0x15   : > { %336 = vmatprep.subr.bf16.mxu0 %v274_v14 }
  0x17   : > { %405 = vperm.xlu0 %767, %v395_v8   ;;  %410 = vperm.xlu1 %768, %v396_v17  }
  0x18   : > { %337 = vmatpush1.bf16.msra.mxu0 %v273_v18 }
  0x1b   : > { %415 = vperm.xlu0 %767, %v397_v19   ;;  %420 = vperm.xlu1 %768, %v398_v21  }
  0x1c   : > { %724 = vmatmul.mubr.msk.bf16.vlgmr.msra.gmra.mxu0 %vm315_vm0, %v769_v20 }
  0x1d   : > { %364 = vmatprep.mubr.bf16.mxu0 %v803_v0 }
  0x1f   : > { %425 = vperm.xlu0 %767, %v399_v22   ;;  %430 = vperm.xlu1 %768, %v400_v23  }
  0x23   : > { %435 = vperm.xlu0 %767, %v401_v24   ;;  %440 = vperm.xlu1 %768, %v402_v26  }
  0x24   : > { %725 = vmatmul.mubr.msk.bf16.gmra.mxu0 %vm315_vm0, %v770_v25 }
  0x25   : > { %507 = vmatprep.mubr.bf16.mxu0 %v803_v0 }
  0x8a   : > { %v298_v30 = vpop.permute.xlu0 %297  ;;  %v288_v31 = vpop.permute.xlu1 %287 }
  0x8e   : > { %v303_v35 = vpop.permute.xlu0 %302  ;;  %v293_v36 = vpop.permute.xlu1 %292 }
  0x92   : > { %v406_v63 = vpop.permute.xlu0 %405  ;;  %v411_v1 = vpop.permute.xlu1 %410 }
  0x96   : > { %v416_v6 = vpop.permute.xlu0 %415  ;;  %v421_v10 = vpop.permute.xlu1 %420 }
  0x9a   : > { %v426_v26 = vpop.permute.xlu0 %425 }
  0xdc   : > { %v356_v27 = vpop.f32.mrf.mxu0 }
  0xdd   : > { %v357_v50 = vadd.f32 %v356_v27, %v288_v31 }
  0xde   : > { %v358_v28 = vpop.f32.mrf.mxu0 }
  0xdf   : > { %v359_v43 = vadd.f32 %v358_v28, %v288_v31  ;;  %v375_v57 = vmax.f32 %v357_v50, 0.0 }
  0xe0   : > { %v360_v29 = vpop.f32.mrf.mxu0 }
  0xe1   : > { %v361_v45 = vadd.f32 %v360_v29, %v293_v36  ;;  %v376_v52 = vmax.f32 %v359_v43, 0.0 }
  0xe2   : > { %v362_v32 = vpop.f32.mrf.mxu0 }
  0xe3   : > { %v363_v38 = vadd.f32 %v362_v32, %v293_v36  ;;  %v377_v54 = vmax.f32 %v361_v45, 0.0 }
  0xe4   : > { %v366_v33 = vpop.f32.mrf.mxu0 }
  0xe5   : > { %v367_v41 = vadd.f32 %v366_v33, %v298_v30  ;;  %v378_v47 = vmax.f32 %v363_v38, 0.0  ;;  %v391_v58 = vpack.c.bf16 %v377_v54, %v375_v57  ;;  %v431_v33 = vpop.permute.xlu1 %430 }
  0xe6   : > { %v368_v34 = vpop.f32.mrf.mxu0 }
  0xe7   : > { %v369_v39 = vadd.f32 %v368_v34, %v298_v30  ;;  %v379_v51 = vmax.f32 %v367_v41, 0.0  ;;  %v392_v56 = vpack.c.bf16 %v378_v47, %v376_v52 }
  0xe8   : > { %v370_v37 = vpop.f32.mrf.mxu0 }
  0xe9   : > { %v371_v40 = vadd.f32 %v370_v37, %v303_v35  ;;  %v380_v48 = vmax.f32 %v369_v39, 0.0 }
  0xea   : > { %v372_v42 = vpop.f32.mrf.mxu0 }
  0xeb   : > { %v373_v44 = vadd.f32 %v372_v42, %v303_v35  ;;  %v381_v46 = vmax.f32 %v371_v40, 0.0 }
  0xed   : > { %v382_v49 = vmax.f32 %v373_v44, 0.0  ;;  %v393_v55 = vpack.c.bf16 %v381_v46, %v379_v51  ;;  %v436_v44 = vpop.permute.xlu0 %435 }
  0xef   : > { %v394_v53 = vpack.c.bf16 %v382_v49, %v380_v48 }
  0xf1   : > { %487 = vmatprep.subr.bf16.mxu0 %v394_v53  ;;  %738 = vmatprep.subr.bf16.mxu1 %v394_v53 }
  0xf2   : > { %488 = vmatpush1.bf16.msra.mxu0 %v393_v55  ;;  %740 = vmatpush1.bf16.msra.mxu1 %v393_v55  ;;  %v441_v55 = vpop.permute.xlu1 %440 }
  0xf3   : > { %489 = vmatprep.subr.bf16.mxu0 %v392_v56  ;;  %739 = vmatprep.subr.bf16.mxu1 %v392_v56 }
  0xf6   : > { %490 = vmatpush1.bf16.msra.mxu0 %v391_v58  ;;  %741 = vmatpush1.bf16.msra.mxu1 %v391_v58 }
  0xf9   : > { %730 = vmatmul.mubr.msk.bf16.vlgmr.msra.gmra.mxu0 %vm315_vm0, %v771_v59  ;;  %731 = vmatmul.mubr.msk.bf16.vlgmr.msra.gmra.mxu1 %vm315_vm0, %v772_v60 }
  0xfa   : > { %527 = vmatprep.mubr.bf16.mxu1 %v803_v0 }
 0x101   : > { %732 = vmatmul.mubr.msk.bf16.gmra.mxu1 %vm315_vm0, %v773_v61 }
 0x102   : > { %537 = vmatprep.mubr.bf16.mxu1 %v803_v0 }
 0x109   : > { %733 = vmatmul.mubr.msk.bf16.gmra.mxu1 %vm315_vm0, %v774_v62 }
 0x1b9   : > { %v509_v2 = vpop.f32.mrf.mxu0  ;;  %v519_v3 = vpop.f32.mrf.mxu1 }
 0x1ba   : > { %v926_v7 = vadd.f32 %v509_v2, %v406_v63  ;;  %v928_v11 = vadd.f32 %v519_v3, %v416_v6 }
 0x1bb   : > { %v511_v4 = vpop.f32.mrf.mxu0  ;;  %v521_v5 = vpop.f32.mrf.mxu1 }
 0x1bc   : > { %v930_v0 = vadd.f32 %v511_v4, %v406_v63  ;;  %v934_v13 = vadd.f32 %v521_v5, %v416_v6  ;;  %v548_v16 = vmul.f32 %v926_v7, %v926_v7  ;;  %v552_v22 = vmul.f32 %v928_v11, %v928_v11 }
 0x1bd   : > { %v513_v8 = vpop.f32.mrf.mxu0  ;;  %v523_v9 = vpop.f32.mrf.mxu1 }
 0x1be   : > { %v932_v12 = vadd.f32 %v513_v8, %v411_v1  ;;  %v940_v18 = vadd.f32 %v523_v9, %v421_v10  ;;  %v549_v23 = vmul.f32 %v930_v0, %v930_v0  ;;  %v553_v27 = vmul.f32 %v934_v13, %v934_v13 }
 0x1bf   : > { %v515_v14 = vpop.f32.mrf.mxu0  ;;  %v525_v15 = vpop.f32.mrf.mxu1 }
 0x1c0   : > { %v550_v17 = vmul.f32 %v932_v12, %v932_v12  ;;  %v942_v19 = vadd.f32 %v515_v14, %v411_v1  ;;  %v944_v20 = vadd.f32 %v525_v15, %v421_v10  ;;  %v554_v29 = vmul.f32 %v940_v18, %v940_v18 }
 0x1c1   : > { %v529_v21 = vpop.f32.mrf.mxu1 }
 0x1c2   : > { %v564_v24 = vadd.f32 %v550_v17, %v548_v16  ;;  %v551_v25 = vmul.f32 %v942_v19, %v942_v19  ;;  %v530_v32 = vadd.f32 %v529_v21, %v426_v26  ;;  %v555_v34 = vmul.f32 %v944_v20, %v944_v20 }
 0x1c3   : > { %v531_v28 = vpop.f32.mrf.mxu1 }
 0x1c4   : > { %v565_v30 = vadd.f32 %v564_v24, %v552_v22  ;;  %v577_v31 = vadd.f32 %v551_v25, %v549_v23  ;;  %v958_v38 = vadd.f32 %v531_v28, %v426_v26  ;;  %v556_v42 = vmul.f32 %v530_v32, %v530_v32 }
 0x1c5   : > { %v533_v35 = vpop.f32.mrf.mxu1 }
 0x1c6   : > { %v566_v36 = vadd.f32 %v565_v30, %v554_v29  ;;  %v578_v37 = vadd.f32 %v577_v31, %v553_v27  ;;  %v534_v39 = vadd.f32 %v533_v35, %v431_v33  ;;  %v557_v47 = vmul.f32 %v958_v38, %v958_v38 }
 0x1c7   : > { %v535_v40 = vpop.f32.mrf.mxu1 }
 0x1c8   : > { %v579_v41 = vadd.f32 %v578_v37, %v555_v34  ;;  %v960_v43 = vadd.f32 %v535_v40, %v431_v33  ;;  %v567_v46 = vadd.f32 %v566_v36, %v556_v42  ;;  %v558_v48 = vmul.f32 %v534_v39, %v534_v39 }
 0x1c9   : > { %v539_v45 = vpop.f32.mrf.mxu1 }
 0x1ca   : > { %v540_v49 = vadd.f32 %v539_v45, %v436_v44  ;;  %v580_v51 = vadd.f32 %v579_v41, %v557_v47  ;;  %v559_v52 = vmul.f32 %v960_v43, %v960_v43  ;;  %v568_v57 = vadd.f32 %v567_v46, %v558_v48 }
 0x1cb   : > { %v541_v50 = vpop.f32.mrf.mxu1 }
 0x1cc   : > { %v560_v53 = vmul.f32 %v540_v49, %v540_v49  ;;  %v542_v54 = vadd.f32 %v541_v50, %v436_v44  ;;  %v581_v61 = vadd.f32 %v580_v51, %v559_v52 }
 0x1cd   : > { %v543_v56 = vpop.f32.mrf.mxu1 }
 0x1ce   : > { %v561_v58 = vmul.f32 %v542_v54, %v542_v54  ;;  %v544_v59 = vadd.f32 %v543_v56, %v441_v55  ;;  %v569_v62 = vadd.f32 %v568_v57, %v560_v53 }
 0x1cf   : > { %v545_v60 = vpop.f32.mrf.mxu1 }
 0x1d0   : > { %v562_v63 = vmul.f32 %v544_v59, %v544_v59  ;;  %v546_v1 = vadd.f32 %v545_v60, %v441_v55  ;;  %v582_v2 = vadd.f32 %v581_v61, %v561_v58 }
 0x1d2   : > { %v570_v3 = vadd.f32 %v569_v62, %v562_v63  ;;  %v563_v4 = vmul.f32 %v546_v1, %v546_v1 }
 0x1d4   : > { %v571_v5 = vrot.slane %v570_v3, 4  ;;  %v583_v6 = vadd.f32 %v582_v2, %v563_v4 }
 0x1d6   : > { %v572_v8 = vadd.f32 %v571_v5, %v570_v3  ;;  %v584_v9 = vrot.slane %v583_v6, 4 }
 0x1d8   : > { %v573_v10 = vrot.slane %v572_v8, 2  ;;  %v585_v14 = vadd.f32 %v584_v9, %v583_v6 }
 0x1da   : > { %v574_v15 = vadd.f32 %v573_v10, %v572_v8  ;;  %v586_v16 = vrot.slane %v585_v14, 2 }
 0x1dc   : > { %v575_v17 = vrot.slane %v574_v15, 1  ;;  %v587_v21 = vadd.f32 %v586_v16, %v585_v14 }
 0x1de   : > { %v576_v22 = vadd.f32 %v575_v17, %v574_v15  ;;  %v588_v23 = vrot.slane %v587_v21, 1 }
 0x1e0   : > { %v590_v24 = vmax.f32 %v576_v22, 1e-24  ;;  %v589_v25 = vadd.f32 %v588_v23, %v587_v21 }
 0x1e2   : > { %775 = vrsqrt.f32 %v590_v24  ;;  %v591_v26 = vmax.f32 %v589_v25, 1e-24 }
 0x1e4   : > { %777 = vrsqrt.f32 %v591_v26 }
 0x1ef   : > { %v776_v27 = vpop.eup %775 }
 0x1f0   : > { %v594_v28 = vmul.f32 %v776_v27, %v926_v7  ;;  %v596_v29 = vmul.f32 %v776_v27, %v932_v12  ;;  %v598_v30 = vmul.f32 %v776_v27, %v928_v11  ;;  %v600_v31 = vmul.f32 %v776_v27, %v940_v18 }
 0x1f1   : > { %v778_v33 = vpop.eup %777  ;;  %v602_v34 = vmul.f32 %v776_v27, %v530_v32  ;;  %v604_v35 = vmul.f32 %v776_v27, %v534_v39  ;;  %v606_v36 = vmul.f32 %v776_v27, %v540_v49  ;;  %v608_v37 = vmul.f32 %v776_v27, %v544_v59 }
 0x1f2   : > { %610 = vst [vmem:[%s970_s23] sm:$0xff] %v594_v28  ;;  %612 = vst [vmem:[%s970_s23 + $0x10] sm:$0xff] %v596_v29  ;;  %v595_v7 = vmul.f32 %v778_v33, %v930_v0  ;;  %v597_v11 = vmul.f32 %v778_v33, %v942_v19  ;;  %v599_v12 = vmul.f32 %v778_v33, %v934_v13 }
 0x1f3   : > { %614 = vst [vmem:[%s970_s23 + $0x20] sm:$0xff] %v598_v30  ;;  %616 = vst [vmem:[%s970_s23 + $0x30] sm:$0xff] %v600_v31  ;;  %v601_v18 = vmul.f32 %v778_v33, %v944_v20  ;;  %v603_v32 = vmul.f32 %v778_v33, %v958_v38  ;;  %v605_v39 = vmul.f32 %v778_v33, %v960_v43 }
 0x1f4   : > { %618 = vst [vmem:[%s970_s23 + $0x40] sm:$0xff] %v602_v34  ;;  %620 = vst [vmem:[%s970_s23 + $0x50] sm:$0xff] %v604_v35  ;;  %v607_v40 = vmul.f32 %v778_v33, %v542_v54  ;;  %v609_v0 = vmul.f32 %v778_v33, %v546_v1 }
 0x1f5   : > { %622 = vst [vmem:[%s970_s23 + $0x60] sm:$0xff] %v606_v36  ;;  %624 = vst [vmem:[%s970_s23 + $0x70] sm:$0xff] %v608_v37 }
 0x1f6   : > { %611 = vst [vmem:[%s970_s23 + $0x8] sm:$0xff] %v595_v7  ;;  %613 = vst [vmem:[%s970_s23 + $0x18] sm:$0xff] %v597_v11 }
 0x1f7   : > { %615 = vst [vmem:[%s970_s23 + $0x28] sm:$0xff] %v599_v12  ;;  %617 = vst [vmem:[%s970_s23 + $0x38] sm:$0xff] %v601_v18 }
 0x1f8   : > { %619 = vst [vmem:[%s970_s23 + $0x48] sm:$0xff] %v603_v32  ;;  %621 = vst [vmem:[%s970_s23 + $0x58] sm:$0xff] %v605_v39 }
 0x1f9   : > { %623 = vst [vmem:[%s970_s23 + $0x68] sm:$0xff] %v607_v40  ;;  %625 = vst [vmem:[%s970_s23 + $0x78] sm:$0xff] %v609_v0 }
 0x1fa PF: > { %s15_s20 = sadd.s32 1, %s801_s20   ;;  %s1013_s18 = smov %s797_s19 }
 0x1fb   : > { %p12_p5 = scmp.ge.s32.totalorder %s15_s20, 4   ;;  %s1014_s19 = smov %s1016_s21 }
 0x1fd   :  { %14 = sbr.rel (!%p12_p5) target bundleno = 2 (0x2), region = 70 }

</bundles_post_ra>
